<compile_context>
chip_gen: v6e
topology: v6e:2x2x1
jax: 0.10.0
libtpu: 0.0.40
codegen_flags: <defaults>
</compile_context>

<pallas_src>
import functools

import jax
import jax.numpy as jnp
from jax.experimental import pallas as pl
from jax.experimental.pallas import tpu as pltpu


def lowrank_linear_kernel(x_ref, v_ref, us_t_ref, o_ref):
    """One row-tile of y = (x @ V) @ (U*S)^T.

    x_ref:    (block_m, in_f)   -- streamed per grid step
    v_ref:    (in_f, rank)      -- VMEM-resident across the whole grid
    us_t_ref: (rank, out_f)     -- VMEM-resident, pre-transposed ([K, N] feed)
    o_ref:    (block_m, out_f)
    """
    # First matmul on the MXU, f32 accumulation.
    t = jnp.dot(x_ref[...], v_ref[...], preferred_element_type=jnp.float32)
    # Second matmul: native [M,K]x[K,N] feed (no per-step weight relayout).
    # NOTE: t is cast to the compute dtype; for bf16 activations this trades a
    # little precision for bandwidth / native MXU passes (exact for f32).
    y = jnp.dot(t.astype(us_t_ref.dtype), us_t_ref[...],
                preferred_element_type=jnp.float32)
    o_ref[...] = y.astype(o_ref.dtype)


@functools.lru_cache(maxsize=1)
def _vmem_info():
    """Return (physical VMEM bytes, streamed working-set budget, vmem limit)."""
    try:
        phys = int(pltpu.get_tpu_info().vmem_capacity_bytes)
    except Exception:
        phys = 64 * 1024 * 1024          # assume the smallest (v7x per-TC)
    mib = 1024 * 1024
    if phys > 96 * mib:                  # v5e / v6e: 128 MiB physical VMEM
        budget = (phys * 2) // 3         # ~85 MiB streamed working set
        vmem_limit = 96 * mib
    else:                                # v7x: 64 MiB physical, least headroom
        budget = min((phys * 2) // 3, 28 * mib)
        vmem_limit = min(56 * mib, max(16 * mib, phys - 8 * mib))
    return phys, budget, vmem_limit


def _choose_block_m(M, in_f, out_f, rank, itemsize, budget):
    """Largest row-tile the VMEM budget allows, but never so large that the
    grid degenerates to 1-2 steps (no pipelining, idle v7x TensorCore)."""
    # Resident weights: counted double-buffered to stay safe even if the
    # Buffered(1) request falls back to default pipelining.
    weight_bytes = 2 * (in_f * rank + rank * out_f) * itemsize
    avail = max(0, budget - weight_bytes)
    per_row = (
        2 * in_f * itemsize              # x tile, double-buffered
        + 2 * out_f * itemsize           # y tile, double-buffered
        + max(rank, 128) * 4             # f32 intermediate t (lane-padded)
        + out_f * 4                      # pre-cast f32 y tile
    )
    cap = min(2048, avail // per_row)    # measured mem-bound plateau ~1-2K rows
    cap = max(8, (cap // 8) * 8)
    # Grid-depth bound: >= ~8 tiles -> DMA/compute overlap, and >= 4 tiles per
    # TensorCore when the "parallel" axis is split across v7x's two cores.
    target_tiles = 8
    depth = pl.cdiv(pl.cdiv(M, target_tiles), 8) * 8
    return max(8, min(cap, depth))


def fold_lowrank_params(u_approx, s_approx, v_approx, dtype=None):
    """Parameter preprocessing (hoist out of the per-forward path):
    fold diag(s) into U and pre-transpose so the kernel sees a [K, N] weight."""
    if dtype is None:
        dtype = u_approx.dtype
    v = v_approx.astype(dtype)                               # (in_f, rank)
    us_t = (u_approx * s_approx[None, :]).T.astype(dtype)    # (rank, out_f)
    return v, us_t


def _build_call(M, in_f, rank, out_f, block_m, dtype, vmem_limit,
                single_buffer_weights):
    m_tiles = pl.cdiv(M, block_m)
    wkw = {"pipeline_mode": pl.Buffered(1)} if single_buffer_weights else {}
    return pl.pallas_call(
        lowrank_linear_kernel,
        out_shape=jax.ShapeDtypeStruct((M, out_f), dtype),
        grid_spec=pltpu.PrefetchScalarGridSpec(
            num_scalar_prefetch=0,
            grid=(m_tiles,),
            in_specs=[
                # x: streamed per row-tile. The ragged last tile (M % block_m
                # != 0) is clamped by Pallas; OOB rows are never stored and
                # rows are independent through both matmuls, so no wrapper
                # pad/slice (and no extra HBM pass) is needed.
                pl.BlockSpec((block_m, in_f), lambda i: (i, 0)),
                # Weights: constant index_map -> VMEM-resident, single DMA.
                pl.BlockSpec((in_f, rank), lambda i: (0, 0), **wkw),
                pl.BlockSpec((rank, out_f), lambda i: (0, 0), **wkw),
            ],
            out_specs=pl.BlockSpec((block_m, out_f), lambda i: (i, 0)),
        ),
        compiler_params=pltpu.CompilerParams(
            # TODO(synk): confirm on v7x (xprof) that this "parallel" axis is
            # actually sharded across both TensorCores; if not, switch to
            # pltpu.CORE_PARALLEL or an explicit leading per-core grid axis.
            dimension_semantics=("parallel",),
            vmem_limit_bytes=int(vmem_limit),
        ),
    )


def lowrank_linear_folded(x, v, us_t, *, block_m=None):
    """y = (x @ v) @ us_t, with x: [..., in_f], v: [in_f, rank], us_t: [rank, out_f]."""
    in_f, rank = v.shape
    out_f = us_t.shape[1]
    orig_shape = x.shape
    x2d = x.reshape(-1, in_f)
    M = x2d.shape[0]
    dtype = x.dtype
    itemsize = jnp.dtype(dtype).itemsize

    _, budget, vmem_limit = _vmem_info()
    if block_m is None:
        block_m = _choose_block_m(M, in_f, out_f, rank, itemsize, budget)
    block_m = max(8, (block_m // 8) * 8)

    v = v.astype(dtype)
    us_t = us_t.astype(dtype)

    try:
        y2d = _build_call(M, in_f, rank, out_f, block_m, dtype, vmem_limit,
                          single_buffer_weights=True)(x2d, v, us_t)
    except Exception:
        # pl.Buffered(1) not accepted by this jax/Mosaic version: fall back to
        # default double-buffered weights (identical semantics, slightly more
        # VMEM for the small resident weights).
        y2d = _build_call(M, in_f, rank, out_f, block_m, dtype, vmem_limit,
                          single_buffer_weights=False)(x2d, v, us_t)

    return y2d.reshape(*orig_shape[:-1], out_f)


def lowrank_linear(x, u_approx, s_approx, v_approx, *, block_m=None):
    """PyTorch-equivalent forward: F.linear(x, U @ diag(S) @ V^T).
    (In a real model, call fold_lowrank_params once and reuse the result.)"""
    v, us_t = fold_lowrank_params(u_approx, s_approx, v_approx, dtype=x.dtype)
    return lowrank_linear_folded(x, v, us_t, block_m=block_m)


if __name__ == "__main__":
    # Deterministic synthetic parameters (shapes from the module's __init__):
    #   original Linear: in_features=32, out_features=32; rank=4
    #   u_approx: [out, rank], s_approx: [rank], v_approx: [in, rank]
    key = jax.random.PRNGKey(0)
    k_x, k_u, k_s, k_v, k_x2 = jax.random.split(key, 5)

    batch, seq = 2, 8
    in_features, out_features, rank = 32, 32, 4

    x = jax.random.normal(k_x, (batch, seq, in_features), dtype=jnp.float32)
    u_approx = jax.random.normal(k_u, (out_features, rank), dtype=jnp.float32) * 0.1
    s_approx = jax.random.uniform(k_s, (rank,), dtype=jnp.float32) + 0.5
    v_approx = jax.random.normal(k_v, (in_features, rank), dtype=jnp.float32) * 0.1

    y = lowrank_linear(x, u_approx, s_approx, v_approx)
    y = jax.block_until_ready(y)

    # Reference (pure JAX, mirrors the PyTorch forward exactly).
    approx_weight = u_approx @ jnp.diag(s_approx) @ v_approx.T   # [out, in]
    y_ref = x @ approx_weight.T
    assert y.shape == (batch, seq, out_features)
    assert jnp.allclose(y, y_ref, atol=1e-5, rtol=1e-5)

    # Ragged-M path (no wrapper pad/slice): M=15 with block_m=8 exercises the
    # clamped last tile + masked writeback.
    x_rag = jax.random.normal(k_x2, (15, in_features), dtype=jnp.float32)
    y_rag = jax.block_until_ready(
        lowrank_linear(x_rag, u_approx, s_approx, v_approx))
    y_rag_ref = x_rag @ approx_weight.T
    assert y_rag.shape == (15, out_features)
    assert jnp.allclose(y_rag, y_rag_ref, atol=1e-5, rtol=1e-5)

    print("KERNEL_OK")
</pallas_src>

<mosaic_0001>
module attributes {stable_mosaic.version = 11 : i64} {
  func.func @lowrank_linear_kernel(%arg0: i32, %arg1: memref<8x32xf32, #tpu.memory_space<vmem>>, %arg2: memref<32x4xf32, #tpu.memory_space<vmem>>, %arg3: memref<4x32xf32, #tpu.memory_space<vmem>>, %arg4: memref<8x32xf32, #tpu.memory_space<vmem>>) attributes {dimension_semantics = [#tpu.dimension_semantics<parallel>], iteration_bounds = array<i64: 2>, scalar_prefetch = 0 : i64, scratch_operands = 0 : i64, tpu.core_type = #tpu.core_type<tc>, window_params = [{transform_indices = @transform_0, window_bounds = array<i64: 8, 32>}, {pipeline_mode = #tpu.pipeline_mode<synchronous>, transform_indices = @transform_1, window_bounds = array<i64: 32, 4>}, {pipeline_mode = #tpu.pipeline_mode<synchronous>, transform_indices = @transform_2, window_bounds = array<i64: 4, 32>}, {transform_indices = @transform_3, window_bounds = array<i64: 8, 32>}]} {
    %c0 = arith.constant 0 : index
    %c0_0 = arith.constant 0 : index
    %0 = vector.load %arg1[%c0, %c0_0] : memref<8x32xf32, #tpu.memory_space<vmem>>, vector<8x32xf32>
    %c0_1 = arith.constant 0 : index
    %c0_2 = arith.constant 0 : index
    %1 = vector.load %arg2[%c0_1, %c0_2] : memref<32x4xf32, #tpu.memory_space<vmem>>, vector<32x4xf32>
    %cst = arith.constant dense<0.000000e+00> : vector<8x4xf32>
    %2 = tpu.matmul %0, %1, %cst {dimension_numbers = #tpu.dot_dimension_numbers<[1], [0], [0], [1], [0, 0, 1, 1], [], []>} : vector<8x32xf32>, vector<32x4xf32>, vector<8x4xf32> -> vector<8x4xf32>
    %c0_3 = arith.constant 0 : index
    %c0_4 = arith.constant 0 : index
    %3 = vector.load %arg3[%c0_3, %c0_4] : memref<4x32xf32, #tpu.memory_space<vmem>>, vector<4x32xf32>
    %cst_5 = arith.constant dense<0.000000e+00> : vector<8x32xf32>
    %4 = tpu.matmul %2, %3, %cst_5 {dimension_numbers = #tpu.dot_dimension_numbers<[1], [0], [0], [1], [0, 0, 1, 1], [], []>} : vector<8x4xf32>, vector<4x32xf32>, vector<8x32xf32> -> vector<8x32xf32>
    %c0_6 = arith.constant 0 : index
    %c0_7 = arith.constant 0 : index
    %5 = vector.load %arg4[%c0_6, %c0_7] : memref<8x32xf32, #tpu.memory_space<vmem>>, vector<8x32xf32>
    tpu.vector_store %arg4[%c0_6, %c0_7], %4 {strides = array<i32>} : memref<8x32xf32, #tpu.memory_space<vmem>>, vector<8x32xf32>,
    return
  }
  func.func @transform_0(%arg0: i32) -> (i32, i32) {
    %c0_i32 = arith.constant 0 : i32
    %c0_i32_0 = arith.constant 0 : i32
    return %arg0, %c0_i32 : i32, i32
  }
  func.func @transform_1(%arg0: i32) -> (i32, i32) {
    %c0_i32 = arith.constant 0 : i32
    %c0_i32_0 = arith.constant 0 : i32
    %c0_i32_1 = arith.constant 0 : i32
    return %c0_i32, %c0_i32_0 : i32, i32
  }
  func.func @transform_2(%arg0: i32) -> (i32, i32) {
    %c0_i32 = arith.constant 0 : i32
    %c0_i32_0 = arith.constant 0 : i32
    %c0_i32_1 = arith.constant 0 : i32
    return %c0_i32, %c0_i32_0 : i32, i32
  }
  func.func @transform_3(%arg0: i32) -> (i32, i32) {
    %c0_i32 = arith.constant 0 : i32
    %c0_i32_0 = arith.constant 0 : i32
    return %arg0, %c0_i32 : i32, i32
  }
}

module attributes {stable_mosaic.version = 11 : i64} {
  func.func @lowrank_linear_kernel(%arg0: i32, %arg1: memref<8x32xf32, #tpu.memory_space<vmem>>, %arg2: memref<32x4xf32, #tpu.memory_space<vmem>>, %arg3: memref<4x32xf32, #tpu.memory_space<vmem>>, %arg4: memref<8x32xf32, #tpu.memory_space<vmem>>) attributes {dimension_semantics = [#tpu.dimension_semantics<parallel>], iteration_bounds = array<i64: 2>, scalar_prefetch = 0 : i64, scratch_operands = 0 : i64, tpu.core_type = #tpu.core_type<tc>, window_params = [{transform_indices = @transform_0, window_bounds = array<i64: 8, 32>}, {pipeline_mode = #tpu.pipeline_mode<synchronous>, transform_indices = @transform_1, window_bounds = array<i64: 32, 4>}, {pipeline_mode = #tpu.pipeline_mode<synchronous>, transform_indices = @transform_2, window_bounds = array<i64: 4, 32>}, {transform_indices = @transform_3, window_bounds = array<i64: 8, 32>}]} {
    %c0 = arith.constant 0 : index
    %c0_0 = arith.constant 0 : index
    %0 = vector.load %arg1[%c0, %c0_0] : memref<8x32xf32, #tpu.memory_space<vmem>>, vector<8x32xf32>
    %c0_1 = arith.constant 0 : index
    %c0_2 = arith.constant 0 : index
    %1 = vector.load %arg2[%c0_1, %c0_2] : memref<32x4xf32, #tpu.memory_space<vmem>>, vector<32x4xf32>
    %cst = arith.constant dense<0.000000e+00> : vector<8x4xf32>
    %2 = tpu.matmul %0, %1, %cst {dimension_numbers = #tpu.dot_dimension_numbers<[1], [0], [0], [1], [0, 0, 1, 1], [], []>} : vector<8x32xf32>, vector<32x4xf32>, vector<8x4xf32> -> vector<8x4xf32>
    %c0_3 = arith.constant 0 : index
    %c0_4 = arith.constant 0 : index
    %3 = vector.load %arg3[%c0_3, %c0_4] : memref<4x32xf32, #tpu.memory_space<vmem>>, vector<4x32xf32>
    %cst_5 = arith.constant dense<0.000000e+00> : vector<8x32xf32>
    %4 = tpu.matmul %2, %3, %cst_5 {dimension_numbers = #tpu.dot_dimension_numbers<[1], [0], [0], [1], [0, 0, 1, 1], [], []>} : vector<8x4xf32>, vector<4x32xf32>, vector<8x32xf32> -> vector<8x32xf32>
    %c0_6 = arith.constant 0 : index
    %c0_7 = arith.constant 0 : index
    %5 = vector.load %arg4[%c0_6, %c0_7] : memref<8x32xf32, #tpu.memory_space<vmem>>, vector<8x32xf32>
    tpu.vector_store %arg4[%c0_6, %c0_7], %4 {strides = array<i32>} : memref<8x32xf32, #tpu.memory_space<vmem>>, vector<8x32xf32>,
    return
  }
  func.func @transform_0(%arg0: i32) -> (i32, i32) {
    %c0_i32 = arith.constant 0 : i32
    %c0_i32_0 = arith.constant 0 : i32
    return %arg0, %c0_i32 : i32, i32
  }
  func.func @transform_1(%arg0: i32) -> (i32, i32) {
    %c0_i32 = arith.constant 0 : i32
    %c0_i32_0 = arith.constant 0 : i32
    %c0_i32_1 = arith.constant 0 : i32
    return %c0_i32, %c0_i32_0 : i32, i32
  }
  func.func @transform_2(%arg0: i32) -> (i32, i32) {
    %c0_i32 = arith.constant 0 : i32
    %c0_i32_0 = arith.constant 0 : i32
    %c0_i32_1 = arith.constant 0 : i32
    return %c0_i32, %c0_i32_0 : i32, i32
  }
  func.func @transform_3(%arg0: i32) -> (i32, i32) {
    %c0_i32 = arith.constant 0 : i32
    %c0_i32_0 = arith.constant 0 : i32
    return %arg0, %c0_i32 : i32, i32
  }
}

</mosaic_0001>

<bundles_post_ra>
// kernel: tpu_custom_call.1
= control target key start
LH: loop header
LB: loop body
LE: loop exit
PB: predicated region body
PF: predicated region fallthrough
CT: control target
= control target key end

     0   :  { %8 = vsyncpa [#allocation3], 0  ;;  %s676_s0 = inlined_call_operand.vmem [shape: f32[16,32], index: 0, kind: input, shape index: {}]   ;;  %s677_s1 = inlined_call_operand.vmem [shape: f32[32,4], index: 1, kind: input, shape index: {}]   ;;  %s678_s2 = inlined_call_operand.vmem [shape: f32[4,32], index: 2, kind: input, shape index: {}]   ;;  %s679_s3 = inlined_call_operand.hbm [shape: f32[16,32], index: 3, kind: output, shape index: {}]  }
   0x1   :  { %10 = vsyncpa [#allocation3 + $0x1], 0  ;;  %s560_s12 = smov 0   ;;  %s562_s13 = smov 0  }
   0x2   :  { %s564_s14 = smov 0   ;;  %s566_s15 = smov 0  }
   0x3 LB: > { %s581_s16 = sadd.s32 4294967295, %s535_s15   ;;  %s398_s17 = sadd.s32 4294967294, %s535_s15   ;;  %s535_s15 = sphi %s566_s15, %s685_s15   ;;  %s531_s14 = sphi %s564_s14, %s684_s14   ;;  %s527_s13 = sphi %s562_s13, %s683_s13   ;;  %s523_s12 = sphi %s560_s12, %s682_s12  }
   0x4   : > { %s585_s18 = sadd.s32 1, %s535_s15   ;;  %s91_s19 = sadd.s32 1, %s531_s14 }
   0x5   : > { %s88_s20 = ssub.s32 %s535_s15, %s585_s18  ;;  %p101_p0 = scmp.ne.s32.totalorder %s531_s14, %s527_s13 }
   0x6   : > { %p89_p1 = scmp.eq.s32.totalorder %s88_s20, 0  ;;  %p102_p2 = scmp.eq.s32.totalorder %s581_s16, 1 }
   0x7   : > { %p107_p3 = scmp.ne.s32.totalorder %s527_s13, %s523_s12  ;;  %p108_p4 = scmp.eq.s32.totalorder %s398_s17, 1 }
   0x8   : > { %s596_s21 = scalar_select %p89_p1, %s531_s14, %s91_s19  }
   0x9   : > { %p598_p5 = por %p102_p2, %p101_p0  ;;  %p602_p6 = por %p108_p4, %p107_p3 }
   0xa   : > { %p401_p7 = scmp.ge.s32.totalorder %s535_s15, 1  ;;  %p139_p8 = scmp.lt.s32.totalorder %s535_s15, 3 }
   0xc   : > { %p140_p9 = pnand %p401_p7, %p139_p8 }
   0xd   : > { %p162_p10 = scmp.lt.s32.totalorder (!%p140_p9), %s581_s16, 1  ;;  %s159_s17 = sand.u32 (!%p140_p9), 1, %s527_s13  }
   0xe   : > { %143 = sbr.rel (%p140_p9) target bundleno = 428 (0x1ac), region = 32  ;;  %s402_s19 = sshll.u32 (!%p140_p9), %s159_s17, 3 }
   0xf   : > { %s408_s20 = sshll.u32 (!%p140_p9), %s581_s16, 7  ;;  %s161_s24 = scalar_lea.vmem (!%p140_p9), [#allocation2], %s402_s19 }
  0x10   : > { %s339_s25 = sshll.u32 (!%p140_p9), %s161_s24, 4  ;;  %s326_s29 = scalar_lea.sflag (!%p140_p9), [#allocation3], %s159_s17  ;;  %s636_s25 = int_to_ptr.vmem [resolvable:$true] %s339_s25 }
  0x11   : > { %s475_s30 = scalar_lea.vmem (!%p140_p9), %s636_s25, 128 }
  0x12   : > { %p476_p11 = scmp.ne.s32.totalorder (!%p140_p9), %s636_s25, %s475_s30 }
  0x13   : > { %v170_v0 = vld [vmem:[%s677_s1 + $0x18] sm:$0xff]  ;;  %v537_v1 = vmov 0.0   ;;  %v169_v2 = vld [vmem:[%s677_s1 + $0x10] sm:$0xff]  ;;  %vm538_vm0 = vmmov 0   ;;  %s163_s28 = scalar_select %p162_p10, %s581_s16, 1  ;;  %v168_v3 = vld [vmem:[%s677_s1 + $0x8] sm:$0xff] }
  0x14   : > { %418 = vmatprep.subr.mxu0 %v537_v1  ;;  %426 = vmatprep.mubr.msk.f32.mxu0 %vm538_vm0, %v537_v1  ;;  %v167_v4 = vld [vmem:[%s677_s1] sm:$0xff]  ;;  %vm171_vm1 = vcmask 261120   ;;  %vm250_vm2 = vcmask 1043456   ;;  %vm246_vm3 = vcmask 31744   ;;  %p477_p12 = pnand %p476_p11, %p598_p5  ;;  %s539_s16 = smov [#allocation2]  }
  0x15   : > { %419 = vmatpush3.msra.mxu0 %v170_v0  ;;  %429 = vmatprep.subr.mxu1 %v537_v1  ;;  %s403_s4 = sshll.u32 %s163_s28, 3  ;;  %v245_v6 = vld [vmem:[%s678_s2] sm:$0xf]  ;;  %s634_s28 = scalar_lea.hbm %s679_s3, %s408_s20 }
  0x16   : > { %420 = vmatprep.subr.mxu0 %v537_v1  ;;  %431 = vmatprep.mubr.msk.f32.mxu1 %vm538_vm0, %v537_v1  ;;  %s165_s9 = scalar_lea.vmem %s676_s0, %s403_s4  ;;  %p478_p13 = pneg %p477_p12 }
  0x17   : > { %421 = vmatpush3.msra.mxu0 %v169_v2  ;;  %v166_v5 = vld [vmem:[%s165_s9] sm:$0xff]  ;;  %430 = vmatpush3.msk.msra.mxu1 %vm250_vm2, %v245_v6  ;;  %s479_s4 = sshll.u32 %s539_s16, 4  ;;  %s480_s4 = int_to_ptr.vmem [resolvable:$false] %s479_s4 }
  0x18   : > { %422 = vmatprep.subr.mxu0 %v537_v1  ;;  %s481_s5 = scalar_lea.vmem %s480_s4, 256  ;;  %p482_p0 = scmp.lt.s32.totalorder %s636_s25, %s480_s4 }
  0x19   : > { %423 = vmatpush3.msra.mxu0 %v168_v3  ;;  %p483_p1 = scmp.lt.s32.totalorder %s481_s5, %s475_s30 }
  0x1a   : > { %424 = vmatprep.subr.mxu0 %v537_v1 }
  0x1b   : > { %425 = vmatpush3.msra.mxu0 %v167_v4  ;;  %p484_p2 = por %p483_p1, %p482_p0 }
  0x1c   : > { %427 = vmatmul.mubr.msk.f32.vlgmr.msra.gmra.mxu0 %vm171_vm1, %v166_v5 }
  0x1d   : > { %p485_p3 = pnand %p484_p2, %p478_p13 }
  0xdc   : > { %v241_v7 = vpop.f32.mrf.mxu0 }
  0xdd   : > { %432 = vmatmul.mubr.msk.f32.vlgmr.msra.gmra.mxu1 %vm246_vm3, %v241_v7 }
  0xde   : > { %v428_v8 = vpop.f32.mrf.mxu0 }
 0x19d   : > { %v320_v9 = vpop.f32.mrf.mxu1 }
 0x19e   : > { %324 = vst.msk [vmem:[%s161_s24] sm:$0xff] %vm171_vm1, %v320_v9 }
 0x19f   : > { %v433_v10 = vpop.f32.mrf.mxu1 }
 0x1a0   : > { %488 = shalt.err (!%p485_p3)
}
 0x1a1   : > { %s489_s6 = scalar_lea.hbm %s634_s28, 128  ;;  %s493_s9 = scalar_lea.hbm %s679_s3, 256 }
 0x1a2   : > { %p490_p4 = scmp.ne.s32.totalorder %s634_s28, %s489_s6  ;;  %p494_p9 = scmp.lt.s32.totalorder %s634_s28, %s679_s3 }
 0x1a3   : > { %p495_p10 = scmp.lt.s32.totalorder %s493_s9, %s489_s6 }
 0x1a4   : > { %p491_p7 = pnand %p490_p4, %p598_p5 }
 0x1a5   : > { %p496_p11 = por %p495_p10, %p494_p9 }
 0x1a6   : > { %p492_p8 = pneg %p491_p7 }
 0x1a8   : > { %p497_p12 = pnand %p496_p11, %p492_p8 }
 0x1aa   : > { %500 = shalt.err (!%p497_p12)
}
 0x1ab   : > { %434 = dma.vmem_to_hbm [thread:$0]  (%p598_p5), %s636_s25, 128, %s634_s28, %s326_s29  }
 0x1ac PF: > { %p440_p13 = scmp.ge.s32.totalorder %s535_s15, 2  ;;  %s351_s17 = sand.u32 1, %s523_s12  }
 0x1ad   : > { %s352_s19 = scalar_lea.sflag [#allocation3], %s351_s17 }
 0x1ae   : > { %p437_p0 = pnand %p440_p13, %p602_p6 }
 0x1b0   : > { %p438_p1 = pneg %p437_p0 }
 0x1b2   : > { %518 = dma.done.wait (%p438_p1), %s352_s19, 128  }
 0x1b3   : > { %520 = vsyncadd (%p438_p1), %s352_s19, 4294967168  ;;  %p13_p2 = scmp.ge.s32.totalorder %s585_s18, 4   ;;  %s682_s12 = smov %s527_s13 }
 0x1b4   : > { %s683_s13 = smov %s531_s14  ;;  %s684_s14 = smov %s596_s21 }
 0x1b5   : > { %s685_s15 = smov %s585_s18  ;;  %15 = sbr.rel (!%p13_p2) target bundleno = 3 (0x3), region = 67 }
 0x1ba   :  { %357 = vsyncpa [#allocation3], 1 }
 0x1bb   :  { %359 = vsyncpa [#allocation3 + $0x1], 1 }

// kernel: tpu_custom_call.1
= control target key start
LH: loop header
LB: loop body
LE: loop exit
PB: predicated region body
PF: predicated region fallthrough
CT: control target
= control target key end

     0   :  { %8 = vsyncpa [#allocation3], 0  ;;  %s676_s0 = inlined_call_operand.vmem [shape: f32[16,32], index: 0, kind: input, shape index: {}]   ;;  %s677_s1 = inlined_call_operand.vmem [shape: f32[32,4], index: 1, kind: input, shape index: {}]   ;;  %s678_s2 = inlined_call_operand.vmem [shape: f32[4,32], index: 2, kind: input, shape index: {}]   ;;  %s679_s3 = inlined_call_operand.hbm [shape: f32[16,32], index: 3, kind: output, shape index: {}]  }
   0x1   :  { %10 = vsyncpa [#allocation3 + $0x1], 0  ;;  %s560_s12 = smov 0   ;;  %s562_s13 = smov 0  }
   0x2   :  { %s564_s14 = smov 0   ;;  %s566_s15 = smov 0  }
   0x3 LB: > { %s581_s16 = sadd.s32 4294967295, %s535_s15   ;;  %s398_s17 = sadd.s32 4294967294, %s535_s15   ;;  %s535_s15 = sphi %s566_s15, %s685_s15   ;;  %s531_s14 = sphi %s564_s14, %s684_s14   ;;  %s527_s13 = sphi %s562_s13, %s683_s13   ;;  %s523_s12 = sphi %s560_s12, %s682_s12  }
   0x4   : > { %s585_s18 = sadd.s32 1, %s535_s15   ;;  %s91_s19 = sadd.s32 1, %s531_s14 }
   0x5   : > { %s88_s20 = ssub.s32 %s535_s15, %s585_s18  ;;  %p101_p0 = scmp.ne.s32.totalorder %s531_s14, %s527_s13 }
   0x6   : > { %p89_p1 = scmp.eq.s32.totalorder %s88_s20, 0  ;;  %p102_p2 = scmp.eq.s32.totalorder %s581_s16, 1 }
   0x7   : > { %p107_p3 = scmp.ne.s32.totalorder %s527_s13, %s523_s12  ;;  %p108_p4 = scmp.eq.s32.totalorder %s398_s17, 1 }
   0x8   : > { %s596_s21 = scalar_select %p89_p1, %s531_s14, %s91_s19  }
   0x9   : > { %p598_p5 = por %p102_p2, %p101_p0  ;;  %p602_p6 = por %p108_p4, %p107_p3 }
   0xa   : > { %p401_p7 = scmp.ge.s32.totalorder %s535_s15, 1  ;;  %p139_p8 = scmp.lt.s32.totalorder %s535_s15, 3 }
   0xc   : > { %p140_p9 = pnand %p401_p7, %p139_p8 }
   0xd   : > { %p162_p10 = scmp.lt.s32.totalorder (!%p140_p9), %s581_s16, 1  ;;  %s159_s17 = sand.u32 (!%p140_p9), 1, %s527_s13  }
   0xe   : > { %143 = sbr.rel (%p140_p9) target bundleno = 428 (0x1ac), region = 32  ;;  %s402_s19 = sshll.u32 (!%p140_p9), %s159_s17, 3 }
   0xf   : > { %s408_s20 = sshll.u32 (!%p140_p9), %s581_s16, 7  ;;  %s161_s24 = scalar_lea.vmem (!%p140_p9), [#allocation2], %s402_s19 }
  0x10   : > { %s339_s25 = sshll.u32 (!%p140_p9), %s161_s24, 4  ;;  %s326_s29 = scalar_lea.sflag (!%p140_p9), [#allocation3], %s159_s17  ;;  %s636_s25 = int_to_ptr.vmem [resolvable:$true] %s339_s25 }
  0x11   : > { %s475_s30 = scalar_lea.vmem (!%p140_p9), %s636_s25, 128 }
  0x12   : > { %p476_p11 = scmp.ne.s32.totalorder (!%p140_p9), %s636_s25, %s475_s30 }
  0x13   : > { %v170_v0 = vld [vmem:[%s677_s1 + $0x18] sm:$0xff]  ;;  %v537_v1 = vmov 0.0   ;;  %v169_v2 = vld [vmem:[%s677_s1 + $0x10] sm:$0xff]  ;;  %vm538_vm0 = vmmov 0   ;;  %s163_s28 = scalar_select %p162_p10, %s581_s16, 1  ;;  %v168_v3 = vld [vmem:[%s677_s1 + $0x8] sm:$0xff] }
  0x14   : > { %418 = vmatprep.subr.mxu0 %v537_v1  ;;  %426 = vmatprep.mubr.msk.f32.mxu0 %vm538_vm0, %v537_v1  ;;  %v167_v4 = vld [vmem:[%s677_s1] sm:$0xff]  ;;  %vm171_vm1 = vcmask 261120   ;;  %vm250_vm2 = vcmask 1043456   ;;  %vm246_vm3 = vcmask 31744   ;;  %p477_p12 = pnand %p476_p11, %p598_p5  ;;  %s539_s16 = smov [#allocation2]  }
  0x15   : > { %419 = vmatpush3.msra.mxu0 %v170_v0  ;;  %429 = vmatprep.subr.mxu1 %v537_v1  ;;  %s403_s4 = sshll.u32 %s163_s28, 3  ;;  %v245_v6 = vld [vmem:[%s678_s2] sm:$0xf]  ;;  %s634_s28 = scalar_lea.hbm %s679_s3, %s408_s20 }
  0x16   : > { %420 = vmatprep.subr.mxu0 %v537_v1  ;;  %431 = vmatprep.mubr.msk.f32.mxu1 %vm538_vm0, %v537_v1  ;;  %s165_s9 = scalar_lea.vmem %s676_s0, %s403_s4  ;;  %p478_p13 = pneg %p477_p12 }
  0x17   : > { %421 = vmatpush3.msra.mxu0 %v169_v2  ;;  %v166_v5 = vld [vmem:[%s165_s9] sm:$0xff]  ;;  %430 = vmatpush3.msk.msra.mxu1 %vm250_vm2, %v245_v6  ;;  %s479_s4 = sshll.u32 %s539_s16, 4  ;;  %s480_s4 = int_to_ptr.vmem [resolvable:$false] %s479_s4 }
  0x18   : > { %422 = vmatprep.subr.mxu0 %v537_v1  ;;  %s481_s5 = scalar_lea.vmem %s480_s4, 256  ;;  %p482_p0 = scmp.lt.s32.totalorder %s636_s25, %s480_s4 }
  0x19   : > { %423 = vmatpush3.msra.mxu0 %v168_v3  ;;  %p483_p1 = scmp.lt.s32.totalorder %s481_s5, %s475_s30 }
  0x1a   : > { %424 = vmatprep.subr.mxu0 %v537_v1 }
  0x1b   : > { %425 = vmatpush3.msra.mxu0 %v167_v4  ;;  %p484_p2 = por %p483_p1, %p482_p0 }
  0x1c   : > { %427 = vmatmul.mubr.msk.f32.vlgmr.msra.gmra.mxu0 %vm171_vm1, %v166_v5 }
  0x1d   : > { %p485_p3 = pnand %p484_p2, %p478_p13 }
  0xdc   : > { %v241_v7 = vpop.f32.mrf.mxu0 }
  0xdd   : > { %432 = vmatmul.mubr.msk.f32.vlgmr.msra.gmra.mxu1 %vm246_vm3, %v241_v7 }
  0xde   : > { %v428_v8 = vpop.f32.mrf.mxu0 }
 0x19d   : > { %v320_v9 = vpop.f32.mrf.mxu1 }
 0x19e   : > { %324 = vst.msk [vmem:[%s161_s24] sm:$0xff] %vm171_vm1, %v320_v9 }
 0x19f   : > { %v433_v10 = vpop.f32.mrf.mxu1 }
 0x1a0   : > { %488 = shalt.err (!%p485_p3)
}
 0x1a1   : > { %s489_s6 = scalar_lea.hbm %s634_s28, 128  ;;  %s493_s9 = scalar_lea.hbm %s679_s3, 256 }
 0x1a2   : > { %p490_p4 = scmp.ne.s32.totalorder %s634_s28, %s489_s6  ;;  %p494_p9 = scmp.lt.s32.totalorder %s634_s28, %s679_s3 }
 0x1a3   : > { %p495_p10 = scmp.lt.s32.totalorder %s493_s9, %s489_s6 }
 0x1a4   : > { %p491_p7 = pnand %p490_p4, %p598_p5 }
 0x1a5   : > { %p496_p11 = por %p495_p10, %p494_p9 }
 0x1a6   : > { %p492_p8 = pneg %p491_p7 }
 0x1a8   : > { %p497_p12 = pnand %p496_p11, %p492_p8 }
 0x1aa   : > { %500 = shalt.err (!%p497_p12)
}
 0x1ab   : > { %434 = dma.vmem_to_hbm [thread:$0]  (%p598_p5), %s636_s25, 128, %s634_s28, %s326_s29  }
 0x1ac PF: > { %p440_p13 = scmp.ge.s32.totalorder %s535_s15, 2  ;;  %s351_s17 = sand.u32 1, %s523_s12  }
 0x1ad   : > { %s352_s19 = scalar_lea.sflag [#allocation3], %s351_s17 }
 0x1ae   : > { %p437_p0 = pnand %p440_p13, %p602_p6 }
 0x1b0   : > { %p438_p1 = pneg %p437_p0 }
 0x1b2   : > { %518 = dma.done.wait (%p438_p1), %s352_s19, 128  }
 0x1b3   : > { %520 = vsyncadd (%p438_p1), %s352_s19, 4294967168  ;;  %p13_p2 = scmp.ge.s32.totalorder %s585_s18, 4   ;;  %s682_s12 = smov %s527_s13 }
 0x1b4   : > { %s683_s13 = smov %s531_s14  ;;  %s684_s14 = smov %s596_s21 }
 0x1b5   : > { %s685_s15 = smov %s585_s18  ;;  %15 = sbr.rel (!%p13_p2) target bundleno = 3 (0x3), region = 67 }
 0x1ba   :  { %357 = vsyncpa [#allocation3], 1 }
 0x1bb   :  { %359 = vsyncpa [#allocation3 + $0x1], 1 }

</bundles_post_ra>
